<compile_context>
chip_gen: v5e
topology: v5e:2x2
jax: 0.10.0
libtpu: 0.0.40
codegen_flags: <defaults>
</compile_context>

<pallas_src>
import jax
import jax.numpy as jnp
from jax.experimental import pallas as pl
from jax.experimental.pallas import tpu as pltpu


def _fused_gcn_kernel(x_ref, ma1_ref, ma2_ref, mb1_ref, mb2_ref,
                      w1t_ref, w2t_ref, w3t_ref, w4t_ref,
                      ost_ref, ots_ref):
    """All four GCN layers in one body: 8 plain 2-D MXU dots + 4 ReLUs.

    x_ref:   (R, C)   stacked input rows, R = B*T*N, row order (b, t, n)
    mXY_ref: (R, R)   block-diagonal adjacency/permutation operators
    wXt_ref: (K, E)   pre-transposed Linear weights
    """
    x = x_ref[...]

    def layer(m_ref, h, wt_ref):
        agg = jnp.dot(m_ref[...], h, preferred_element_type=jnp.float32)
        emb = jnp.dot(agg, wt_ref[...], preferred_element_type=jnp.float32)
        return jnp.maximum(emb, 0.0)

    # Path A: spatial -> (permute folded into ma2 rows/cols) -> temporal.
    h1 = layer(ma1_ref, x, w1t_ref)                       # rows (b, n, t)
    ost_ref[...] = layer(ma2_ref, h1, w2t_ref).astype(ost_ref.dtype)  # rows (n, b, t)

    # Path B: temporal -> (permute folded) -> spatial -> final permute folded.
    h3 = layer(mb1_ref, x, w3t_ref)                       # rows (b, t, n)
    ots_ref[...] = layer(mb2_ref, h3, w4t_ref).astype(ots_ref.dtype)  # rows (n, b, t)


@jax.jit
def sparse_graph_convolution(graph, spatial_adj, temporal_adj, w1, w2, w3, w4):
    """Forward pass of SparseGraphConvolution.

    graph:        (B, T, N, F)  -- feature 0 is dropped, C = F - 1
    spatial_adj:  (T, B, N, N)
    temporal_adj: (N, B, T, T)
    w1, w3: (E, C); w2, w4: (E, E)   (nn.Linear weights, bias=False)
    Returns two (N, B, T, E) tensors, exactly as the PyTorch module.
    """
    B, T, N, Ffull = graph.shape
    C = Ffull - 1
    E = w1.shape[0]
    dt = graph.dtype
    R = B * T * N

    # Stacked input rows in (b, t, n) order -- graph's natural layout, no transpose.
    x = graph[..., 1:].reshape(R, C)

    # Block-diagonal operators (pure 0/1-masked layout plumbing, built in the
    # wrapper; each is a tiny broadcast-multiply fusion in XLA).  Row/column
    # orderings fold every torch .permute of the forward into the matmul.
    eB = jnp.eye(B, dtype=dt)
    eT = jnp.eye(T, dtype=dt)
    eN = jnp.eye(N, dtype=dt)
    # ma1[(b,n,t),(b,t,n')] = spatial_adj[t,b,n,n']      (stage-1 A + T<->N reorder)
    ma1 = jnp.einsum('tbnm,bc,ts->bntcsm', spatial_adj, eB, eT).reshape(R, R)
    # ma2[(n,b,t),(b,n,t')] = temporal_adj[n,b,t,t']     (stage-2 A, output (N,B,T))
    ma2 = jnp.einsum('nbts,bc,nm->nbtcms', temporal_adj, eB, eN).reshape(R, R)
    # mb1[(b,t,n),(b,t',n)] = temporal_adj[n,b,t,t']     (stage-1 A + reorder)
    mb1 = jnp.einsum('nbts,bc,nm->btncsm', temporal_adj, eB, eN).reshape(R, R)
    # mb2[(n,b,t),(b,t,n')] = spatial_adj[t,b,n,n']      (stage-2 A + final permute)
    mb2 = jnp.einsum('tbnm,bc,ts->nbtcsm', spatial_adj, eB, eT).reshape(R, R)

    def full2(d0, d1):
        return pl.BlockSpec((d0, d1), lambda i: (0, 0))

    out_st_flat, out_ts_flat = pl.pallas_call(
        _fused_gcn_kernel,
        out_shape=(jax.ShapeDtypeStruct((R, E), dt),
                   jax.ShapeDtypeStruct((R, E), dt)),
        grid_spec=pl.GridSpec(
            grid=(1,),  # single step: whole problem is one VMEM-resident block
            in_specs=[full2(R, C),
                      full2(R, R), full2(R, R), full2(R, R), full2(R, R),
                      full2(C, E), full2(E, E), full2(C, E), full2(E, E)],
            out_specs=(full2(R, E), full2(R, E)),
        ),
        # Single-step kernel: no megacore split.  On v7x a grid=(B,) "parallel"
        # variant could shard across the 2 TCs, but per review it should only
        # be adopted if an A/B measurement shows it beats the single-step form.
        compiler_params=pltpu.CompilerParams(
            dimension_semantics=("arbitrary",)),
    )(x, ma1, ma2, mb1, mb2, w1.T, w2.T, w3.T, w4.T)

    out_st = out_st_flat.reshape(N, B, T, E)
    out_ts = out_ts_flat.reshape(N, B, T, E)
    return out_st, out_ts


def _reference(graph, spatial_adj, temporal_adj, w1, w2, w3, w4):
    """Plain-JAX mirror of the PyTorch forward (HIGHEST precision matmuls)."""
    hp = jax.lax.Precision.HIGHEST
    g = graph[:, :, :, 1:]
    spa = jnp.transpose(g, (1, 0, 2, 3))             # (T, B, N, C)
    tem = jnp.transpose(spa, (2, 1, 0, 3))           # (N, B, T, C)

    def gcn(x, a, w):
        ax = jnp.matmul(a, x, precision=hp)
        return jnp.maximum(jnp.matmul(ax, w.T, precision=hp), 0.0)

    f_spa = gcn(spa, spatial_adj, w1)                # (T, B, N, E)
    f_spa = jnp.transpose(f_spa, (2, 1, 0, 3))       # (N, B, T, E)
    out_st = gcn(f_spa, temporal_adj, w2)            # (N, B, T, E)

    f_tem = gcn(tem, temporal_adj, w3)               # (N, B, T, E)
    f_tem = jnp.transpose(f_tem, (2, 1, 0, 3))       # (T, B, N, E)
    out_ts = gcn(f_tem, spatial_adj, w4)             # (T, B, N, E)
    return out_st, jnp.transpose(out_ts, (2, 1, 0, 3))


if __name__ == "__main__":
    # Small shapes consistent with the module defaults (in_dims=16, embed=16):
    # B=2 sequences, T=8 time steps, N=4 graph nodes; graph carries in_dims+1
    # features (feature 0 is dropped by the forward).
    B, T, N = 2, 8, 4
    in_dims, embed = 16, 16

    key = jax.random.PRNGKey(0)
    kg, ka, kb, k1, k2, k3, k4 = jax.random.split(key, 7)
    graph = jax.random.normal(kg, (B, T, N, in_dims + 1), dtype=jnp.float32)
    spatial_adj = jax.random.normal(ka, (T, B, N, N), dtype=jnp.float32) * 0.5
    temporal_adj = jax.random.normal(kb, (N, B, T, T), dtype=jnp.float32) * 0.5
    w1 = jax.random.normal(k1, (embed, in_dims), dtype=jnp.float32) * 0.2
    w2 = jax.random.normal(k2, (embed, embed), dtype=jnp.float32) * 0.2
    w3 = jax.random.normal(k3, (embed, in_dims), dtype=jnp.float32) * 0.2
    w4 = jax.random.normal(k4, (embed, embed), dtype=jnp.float32) * 0.2

    out_st, out_ts = sparse_graph_convolution(
        graph, spatial_adj, temporal_adj, w1, w2, w3, w4)
    out_st, out_ts = jax.block_until_ready((out_st, out_ts))

    ref_st, ref_ts = _reference(graph, spatial_adj, temporal_adj, w1, w2, w3, w4)
    assert out_st.shape == ref_st.shape == (N, B, T, embed)
    assert out_ts.shape == ref_ts.shape == (N, B, T, embed)
    # Tightened tolerance (per review): both sides run f32 matmuls, so they
    # should agree far below 1e-3.
    assert jnp.allclose(out_st, ref_st, atol=1e-3, rtol=1e-3), \
        float(jnp.max(jnp.abs(out_st - ref_st)))
    assert jnp.allclose(out_ts, ref_ts, atol=1e-3, rtol=1e-3), \
        float(jnp.max(jnp.abs(out_ts - ref_ts)))
    print("KERNEL_OK")
</pallas_src>

<mosaic_0001>
module attributes {stable_mosaic.version = 11 : i64} {
  func.func @_fused_gcn_kernel(%arg0: i32, %arg1: memref<64x16xf32, #tpu.memory_space<vmem>>, %arg2: memref<64x64xf32, #tpu.memory_space<vmem>>, %arg3: memref<64x64xf32, #tpu.memory_space<vmem>>, %arg4: memref<64x64xf32, #tpu.memory_space<vmem>>, %arg5: memref<64x64xf32, #tpu.memory_space<vmem>>, %arg6: memref<16x16xf32, #tpu.memory_space<vmem>>, %arg7: memref<16x16xf32, #tpu.memory_space<vmem>>, %arg8: memref<16x16xf32, #tpu.memory_space<vmem>>, %arg9: memref<16x16xf32, #tpu.memory_space<vmem>>, %arg10: memref<64x16xf32, #tpu.memory_space<vmem>>, %arg11: memref<64x16xf32, #tpu.memory_space<vmem>>) attributes {dimension_semantics = [#tpu.dimension_semantics<arbitrary>], iteration_bounds = array<i64: 1>, scalar_prefetch = 0 : i64, scratch_operands = 0 : i64, tpu.core_type = #tpu.core_type<tc>, window_params = [{pipeline_mode = #tpu.pipeline_mode<synchronous>, transform_indices = @transform_0, window_bounds = array<i64: 64, 16>}, {pipeline_mode = #tpu.pipeline_mode<synchronous>, transform_indices = @transform_1, window_bounds = array<i64: 64, 64>}, {pipeline_mode = #tpu.pipeline_mode<synchronous>, transform_indices = @transform_2, window_bounds = array<i64: 64, 64>}, {pipeline_mode = #tpu.pipeline_mode<synchronous>, transform_indices = @transform_3, window_bounds = array<i64: 64, 64>}, {pipeline_mode = #tpu.pipeline_mode<synchronous>, transform_indices = @transform_4, window_bounds = array<i64: 64, 64>}, {pipeline_mode = #tpu.pipeline_mode<synchronous>, transform_indices = @transform_5, window_bounds = array<i64: 16, 16>}, {pipeline_mode = #tpu.pipeline_mode<synchronous>, transform_indices = @transform_6, window_bounds = array<i64: 16, 16>}, {pipeline_mode = #tpu.pipeline_mode<synchronous>, transform_indices = @transform_7, window_bounds = array<i64: 16, 16>}, {pipeline_mode = #tpu.pipeline_mode<synchronous>, transform_indices = @transform_8, window_bounds = array<i64: 16, 16>}, {pipeline_mode = #tpu.pipeline_mode<synchronous>, transform_indices = @transform_9, window_bounds = array<i64: 64, 16>}, {pipeline_mode = #tpu.pipeline_mode<synchronous>, transform_indices = @transform_10, window_bounds = array<i64: 64, 16>}]} {
    %c0 = arith.constant 0 : index
    %c0_0 = arith.constant 0 : index
    %0 = vector.load %arg1[%c0, %c0_0] : memref<64x16xf32, #tpu.memory_space<vmem>>, vector<64x16xf32>
    %c0_1 = arith.constant 0 : index
    %c0_2 = arith.constant 0 : index
    %1 = vector.load %arg2[%c0_1, %c0_2] : memref<64x64xf32, #tpu.memory_space<vmem>>, vector<64x64xf32>
    %cst = arith.constant dense<0.000000e+00> : vector<64x16xf32>
    %2 = tpu.matmul %1, %0, %cst {dimension_numbers = #tpu.dot_dimension_numbers<[1], [0], [0], [1], [0, 0, 1, 1], [], []>} : vector<64x64xf32>, vector<64x16xf32>, vector<64x16xf32> -> vector<64x16xf32>
    %c0_3 = arith.constant 0 : index
    %c0_4 = arith.constant 0 : index
    %3 = vector.load %arg6[%c0_3, %c0_4] : memref<16x16xf32, #tpu.memory_space<vmem>>, vector<16x16xf32>
    %cst_5 = arith.constant dense<0.000000e+00> : vector<64x16xf32>
    %4 = tpu.matmul %2, %3, %cst_5 {dimension_numbers = #tpu.dot_dimension_numbers<[1], [0], [0], [1], [0, 0, 1, 1], [], []>} : vector<64x16xf32>, vector<16x16xf32>, vector<64x16xf32> -> vector<64x16xf32>
    %cst_6 = arith.constant 0.000000e+00 : f32
    %5 = vector.broadcast %cst_6 : f32 to vector<64x16xf32>
    %6 = arith.maximumf %4, %5 : vector<64x16xf32>
    %c0_7 = arith.constant 0 : index
    %c0_8 = arith.constant 0 : index
    %7 = vector.load %arg3[%c0_7, %c0_8] : memref<64x64xf32, #tpu.memory_space<vmem>>, vector<64x64xf32>
    %cst_9 = arith.constant dense<0.000000e+00> : vector<64x16xf32>
    %8 = tpu.matmul %7, %6, %cst_9 {dimension_numbers = #tpu.dot_dimension_numbers<[1], [0], [0], [1], [0, 0, 1, 1], [], []>} : vector<64x64xf32>, vector<64x16xf32>, vector<64x16xf32> -> vector<64x16xf32>
    %c0_10 = arith.constant 0 : index
    %c0_11 = arith.constant 0 : index
    %9 = vector.load %arg7[%c0_10, %c0_11] : memref<16x16xf32, #tpu.memory_space<vmem>>, vector<16x16xf32>
    %cst_12 = arith.constant dense<0.000000e+00> : vector<64x16xf32>
    %10 = tpu.matmul %8, %9, %cst_12 {dimension_numbers = #tpu.dot_dimension_numbers<[1], [0], [0], [1], [0, 0, 1, 1], [], []>} : vector<64x16xf32>, vector<16x16xf32>, vector<64x16xf32> -> vector<64x16xf32>
    %cst_13 = arith.constant 0.000000e+00 : f32
    %11 = vector.broadcast %cst_13 : f32 to vector<64x16xf32>
    %12 = arith.maximumf %10, %11 : vector<64x16xf32>
    %c0_14 = arith.constant 0 : index
    %c0_15 = arith.constant 0 : index
    %13 = vector.load %arg10[%c0_14, %c0_15] : memref<64x16xf32, #tpu.memory_space<vmem>>, vector<64x16xf32>
    tpu.vector_store %arg10[%c0_14, %c0_15], %12 {strides = array<i32>} : memref<64x16xf32, #tpu.memory_space<vmem>>, vector<64x16xf32>,
    %c0_16 = arith.constant 0 : index
    %c0_17 = arith.constant 0 : index
    %14 = vector.load %arg4[%c0_16, %c0_17] : memref<64x64xf32, #tpu.memory_space<vmem>>, vector<64x64xf32>
    %cst_18 = arith.constant dense<0.000000e+00> : vector<64x16xf32>
    %15 = tpu.matmul %14, %0, %cst_18 {dimension_numbers = #tpu.dot_dimension_numbers<[1], [0], [0], [1], [0, 0, 1, 1], [], []>} : vector<64x64xf32>, vector<64x16xf32>, vector<64x16xf32> -> vector<64x16xf32>
    %c0_19 = arith.constant 0 : index
    %c0_20 = arith.constant 0 : index
    %16 = vector.load %arg8[%c0_19, %c0_20] : memref<16x16xf32, #tpu.memory_space<vmem>>, vector<16x16xf32>
    %cst_21 = arith.constant dense<0.000000e+00> : vector<64x16xf32>
    %17 = tpu.matmul %15, %16, %cst_21 {dimension_numbers = #tpu.dot_dimension_numbers<[1], [0], [0], [1], [0, 0, 1, 1], [], []>} : vector<64x16xf32>, vector<16x16xf32>, vector<64x16xf32> -> vector<64x16xf32>
    %cst_22 = arith.constant 0.000000e+00 : f32
    %18 = vector.broadcast %cst_22 : f32 to vector<64x16xf32>
    %19 = arith.maximumf %17, %18 : vector<64x16xf32>
    %c0_23 = arith.constant 0 : index
    %c0_24 = arith.constant 0 : index
    %20 = vector.load %arg5[%c0_23, %c0_24] : memref<64x64xf32, #tpu.memory_space<vmem>>, vector<64x64xf32>
    %cst_25 = arith.constant dense<0.000000e+00> : vector<64x16xf32>
    %21 = tpu.matmul %20, %19, %cst_25 {dimension_numbers = #tpu.dot_dimension_numbers<[1], [0], [0], [1], [0, 0, 1, 1], [], []>} : vector<64x64xf32>, vector<64x16xf32>, vector<64x16xf32> -> vector<64x16xf32>
    %c0_26 = arith.constant 0 : index
    %c0_27 = arith.constant 0 : index
    %22 = vector.load %arg9[%c0_26, %c0_27] : memref<16x16xf32, #tpu.memory_space<vmem>>, vector<16x16xf32>
    %cst_28 = arith.constant dense<0.000000e+00> : vector<64x16xf32>
    %23 = tpu.matmul %21, %22, %cst_28 {dimension_numbers = #tpu.dot_dimension_numbers<[1], [0], [0], [1], [0, 0, 1, 1], [], []>} : vector<64x16xf32>, vector<16x16xf32>, vector<64x16xf32> -> vector<64x16xf32>
    %cst_29 = arith.constant 0.000000e+00 : f32
    %24 = vector.broadcast %cst_29 : f32 to vector<64x16xf32>
    %25 = arith.maximumf %23, %24 : vector<64x16xf32>
    %c0_30 = arith.constant 0 : index
    %c0_31 = arith.constant 0 : index
    %26 = vector.load %arg11[%c0_30, %c0_31] : memref<64x16xf32, #tpu.memory_space<vmem>>, vector<64x16xf32>
    tpu.vector_store %arg11[%c0_30, %c0_31], %25 {strides = array<i32>} : memref<64x16xf32, #tpu.memory_space<vmem>>, vector<64x16xf32>,
    return
  }
  func.func @transform_0(%arg0: i32) -> (i32, i32) {
    %c0_i32 = arith.constant 0 : i32
    %c0_i32_0 = arith.constant 0 : i32
    %c0_i32_1 = arith.constant 0 : i32
    return %c0_i32, %c0_i32_0 : i32, i32
  }
  func.func @transform_1(%arg0: i32) -> (i32, i32) {
    %c0_i32 = arith.constant 0 : i32
    %c0_i32_0 = arith.constant 0 : i32
    %c0_i32_1 = arith.constant 0 : i32
    return %c0_i32, %c0_i32_0 : i32, i32
  }
  func.func @transform_2(%arg0: i32) -> (i32, i32) {
    %c0_i32 = arith.constant 0 : i32
    %c0_i32_0 = arith.constant 0 : i32
    %c0_i32_1 = arith.constant 0 : i32
    return %c0_i32, %c0_i32_0 : i32, i32
  }
  func.func @transform_3(%arg0: i32) -> (i32, i32) {
    %c0_i32 = arith.constant 0 : i32
    %c0_i32_0 = arith.constant 0 : i32
    %c0_i32_1 = arith.constant 0 : i32
    return %c0_i32, %c0_i32_0 : i32, i32
  }
  func.func @transform_4(%arg0: i32) -> (i32, i32) {
    %c0_i32 = arith.constant 0 : i32
    %c0_i32_0 = arith.constant 0 : i32
    %c0_i32_1 = arith.constant 0 : i32
    return %c0_i32, %c0_i32_0 : i32, i32
  }
  func.func @transform_5(%arg0: i32) -> (i32, i32) {
    %c0_i32 = arith.constant 0 : i32
    %c0_i32_0 = arith.constant 0 : i32
    %c0_i32_1 = arith.constant 0 : i32
    return %c0_i32, %c0_i32_0 : i32, i32
  }
  func.func @transform_6(%arg0: i32) -> (i32, i32) {
    %c0_i32 = arith.constant 0 : i32
    %c0_i32_0 = arith.constant 0 : i32
    %c0_i32_1 = arith.constant 0 : i32
    return %c0_i32, %c0_i32_0 : i32, i32
  }
  func.func @transform_7(%arg0: i32) -> (i32, i32) {
    %c0_i32 = arith.constant 0 : i32
    %c0_i32_0 = arith.constant 0 : i32
    %c0_i32_1 = arith.constant 0 : i32
    return %c0_i32, %c0_i32_0 : i32, i32
  }
  func.func @transform_8(%arg0: i32) -> (i32, i32) {
    %c0_i32 = arith.constant 0 : i32
    %c0_i32_0 = arith.constant 0 : i32
    %c0_i32_1 = arith.constant 0 : i32
    return %c0_i32, %c0_i32_0 : i32, i32
  }
  func.func @transform_9(%arg0: i32) -> (i32, i32) {
    %c0_i32 = arith.constant 0 : i32
    %c0_i32_0 = arith.constant 0 : i32
    %c0_i32_1 = arith.constant 0 : i32
    return %c0_i32, %c0_i32_0 : i32, i32
  }
  func.func @transform_10(%arg0: i32) -> (i32, i32) {
    %c0_i32 = arith.constant 0 : i32
    %c0_i32_0 = arith.constant 0 : i32
    %c0_i32_1 = arith.constant 0 : i32
    return %c0_i32, %c0_i32_0 : i32, i32
  }
}

</mosaic_0001>

<bundles_post_ra>
// kernel: sparse_graph_convolution.1
= control target key start
LH: loop header
LB: loop body
LE: loop exit
PB: predicated region body
PF: predicated region fallthrough
CT: control target
= control target key end

     0   :  { %16 = vsyncpa [#allocation3], 0  ;;  %s1105_s0 = inlined_call_operand.vmem [shape: f32[64,16], index: 0, kind: input, shape index: {}]   ;;  %s1106_s1 = inlined_call_operand.vmem [shape: f32[64,64], index: 1, kind: input, shape index: {}]   ;;  %s1107_s2 = inlined_call_operand.vmem [shape: f32[64,64], index: 2, kind: input, shape index: {}]   ;;  %s1108_s3 = inlined_call_operand.vmem [shape: f32[64,64], index: 3, kind: input, shape index: {}]   ;;  %s1109_s4 = inlined_call_operand.vmem [shape: f32[64,64], index: 4, kind: input, shape index: {}]   ;;  %s1110_s5 = inlined_call_operand.vmem [shape: f32[16,16], index: 5, kind: input, shape index: {}]   ;;  %s1111_s6 = inlined_call_operand.vmem [shape: f32[16,16], index: 6, kind: input, shape index: {}]   ;;  %s1112_s7 = inlined_call_operand.vmem [shape: f32[16,16], index: 7, kind: input, shape index: {}]   ;;  %s1113_s8 = inlined_call_operand.vmem [shape: f32[16,16], index: 8, kind: input, shape index: {}]   ;;  %s1114_s9 = inlined_call_operand.hbm [shape: f32[64,16], index: 9, kind: output, shape index: {0}]   ;;  %s1115_s10 = inlined_call_operand.hbm [shape: f32[64,16], index: 10, kind: output, shape index: {1}]  }
   0x1   :  { %v43_v0 = vld [vmem:[%s1105_s0 + $0x38] sm:$0xff]  ;;  %v42_v1 = vld [vmem:[%s1105_s0 + $0x30] sm:$0xff]  ;;  %v41_v2 = vld [vmem:[%s1105_s0 + $0x28] sm:$0xff] }
   0x2   :  { %85 = vmatpush.msra.mxu0 %v43_v0  ;;  %v40_v3 = vld [vmem:[%s1105_s0 + $0x20] sm:$0xff] }
   0x4   :  { %86 = vmatpush.msra.mxu0 %v42_v1 }
   0x5   :  { %17 = vsyncpa [#allocation5], 0  ;;  %v39_v4 = vld [vmem:[%s1105_s0 + $0x18] sm:$0xff]  ;;  %v38_v5 = vld [vmem:[%s1105_s0 + $0x10] sm:$0xff]  ;;  %vm52_vm0 = vcmask 523264   ;;  %vm120_vm1 = vcmask 130048  }
   0x6   :  { %87 = vmatpush.msra.mxu0 %v41_v2  ;;  %v37_v6 = vld [vmem:[%s1105_s0 + $0x8] sm:$0xff]  ;;  %v36_v7 = vld [vmem:[%s1105_s0] sm:$0xff]  ;;  %v46_v10 = vld [vmem:[%s1106_s1 + $0x10] sm:$0xff]  ;;  %s660_s16 = sshll.u32 %s1114_s9, 4  ;;  %s811_s17 = smov 128   ;;  %s661_s16 = int_to_ptr.hbm [resolvable:$true] %s660_s16 }
   0x7   :  { %v44_v8 = vld [vmem:[%s1106_s1] sm:$0xff]  ;;  %v45_v9 = vld [vmem:[%s1106_s1 + $0x8] sm:$0xff]  ;;  %v47_v11 = vld [vmem:[%s1106_s1 + $0x18] sm:$0xff]  ;;  %s812_s18 = smov 8   ;;  %s813_s9 = smov [#allocation4]  }
   0x8   :  { %88 = vmatpush.msra.mxu0 %v40_v3  ;;  %v119_v12 = vld [vmem:[%s1110_s5 + $0x8] sm:$0xff]  ;;  %v48_v13 = vld [vmem:[%s1106_s1 + $0x20] sm:$0xff]  ;;  %v50_v15 = vld [vmem:[%s1106_s1 + $0x30] sm:$0xff]  ;;  %s673_s19 = sshll.u32 %s1115_s10, 4  ;;  %s674_s19 = int_to_ptr.hbm [resolvable:$true] %s673_s19 }
   0x9   :  { %159 = vmatpush.msra.mxu1 %v119_v12  ;;  %v49_v14 = vld [vmem:[%s1106_s1 + $0x28] sm:$0xff]  ;;  %v51_v16 = vld [vmem:[%s1106_s1 + $0x38] sm:$0xff]  ;;  %v118_v17 = vld [vmem:[%s1110_s5] sm:$0xff] }
   0xa   :  { %89 = vmatpush.msra.mxu0 %v39_v4  ;;  %v194_v42 = vld [vmem:[%s1107_s2] sm:$0xff]  ;;  %v195_v43 = vld [vmem:[%s1107_s2 + $0x8] sm:$0xff]  ;;  %v196_v44 = vld [vmem:[%s1107_s2 + $0x10] sm:$0xff] }
   0xb   :  { %160 = vmatpush.msra.mxu1 %v118_v17  ;;  %v197_v45 = vld [vmem:[%s1107_s2 + $0x18] sm:$0xff]  ;;  %v350_v46 = vld [vmem:[%s1108_s3] sm:$0xff]  ;;  %v351_v48 = vld [vmem:[%s1108_s3 + $0x8] sm:$0xff] }
   0xc   :  { %90 = vmatpush.msra.mxu0 %v38_v5  ;;  %v198_v47 = vld [vmem:[%s1107_s2 + $0x20] sm:$0xff]  ;;  %v199_v49 = vld [vmem:[%s1107_s2 + $0x28] sm:$0xff]  ;;  %v352_v50 = vld [vmem:[%s1108_s3 + $0x10] sm:$0xff] }
   0xd   :  { %390 = vmatpush.msrb.mxu1 %v43_v0  ;;  %v200_v51 = vld [vmem:[%s1107_s2 + $0x30] sm:$0xff]  ;;  %v353_v52 = vld [vmem:[%s1108_s3 + $0x18] sm:$0xff]  ;;  %v268_v53 = vld [vmem:[%s1111_s6 + $0x8] sm:$0xff] }
   0xe   :  { %91 = vmatpush.msra.mxu0 %v37_v6  ;;  %307 = vmatpush.msra.mxu3 %v268_v53  ;;  %v201_v54 = vld [vmem:[%s1107_s2 + $0x38] sm:$0xff]  ;;  %v354_v55 = vld [vmem:[%s1108_s3 + $0x20] sm:$0xff]  ;;  %v355_v56 = vld [vmem:[%s1108_s3 + $0x28] sm:$0xff] }
   0xf   :  { %391 = vmatpush.msrb.mxu1 %v42_v1  ;;  %v356_v57 = vld [vmem:[%s1108_s3 + $0x30] sm:$0xff]  ;;  %v357_v58 = vld [vmem:[%s1108_s3 + $0x38] sm:$0xff]  ;;  %v267_v59 = vld [vmem:[%s1111_s6] sm:$0xff]  ;;  %s671_s3 = sshll.u32 %s813_s9, 4  ;;  %s672_s3 = int_to_ptr.vmem [resolvable:$true] %s671_s3 }
  0x10   :  { %92 = vmatpush.msra.mxu0 %v36_v7  ;;  %308 = vmatpush.msra.mxu3 %v267_v59  ;;  %v424_v63 = vld [vmem:[%s1112_s7 + $0x8] sm:$0xff]  ;;  %v423_v1 = vld [vmem:[%s1112_s7] sm:$0xff] }
  0x11   :  { %690 = vmatmul.msk.f32.vlgmr.msra.gmra.mxu0 %vm52_vm0, %v44_v8  ;;  %392 = vmatpush.msrb.mxu1 %v41_v2  ;;  %v503_v53 = vld [vmem:[%s1109_s4 + $0x28] sm:$0xff] }
  0x12   :  { %463 = vmatpush.msrb.mxu3 %v424_v63 }
  0x13   :  { %393 = vmatpush.msrb.mxu1 %v40_v3 }
  0x14   :  { %464 = vmatpush.msrb.mxu3 %v423_v1 }
  0x15   :  { %394 = vmatpush.msrb.mxu1 %v39_v4 }
  0x17   :  { %395 = vmatpush.msrb.mxu1 %v38_v5 }
  0x19   :  { %691 = vmatmul.msk.f32.gmra.mxu0 %vm52_vm0, %v45_v9  ;;  %396 = vmatpush.msrb.mxu1 %v37_v6 }
  0x1b   :  { %397 = vmatpush.msrb.mxu1 %v36_v7 }
  0x21   :  { %692 = vmatmul.msk.f32.gmra.mxu0 %vm52_vm0, %v46_v10 }
  0x29   :  { %693 = vmatmul.msk.f32.gmra.mxu0 %vm52_vm0, %v47_v11 }
  0x31   :  { %694 = vmatmul.msk.f32.gmra.mxu0 %vm52_vm0, %v48_v13 }
  0x39   :  { %695 = vmatmul.msk.f32.gmra.mxu0 %vm52_vm0, %v49_v14 }
  0x41   :  { %696 = vmatmul.msk.f32.gmra.mxu0 %vm52_vm0, %v50_v15 }
  0x49   :  { %697 = vmatmul.msk.f32.gmra.mxu0 %vm52_vm0, %v51_v16 }
  0x8e   :  { %v94_v18 = vpop.f32.mrf.mxu0 }
  0x8f   :  { %698 = vmatmul.msk.f32.vlgmr.msra.gmra.mxu1 %vm120_vm1, %v94_v18 }
  0x96   :  { %v97_v19 = vpop.f32.mrf.mxu0 }
  0x97   :  { %699 = vmatmul.msk.f32.gmra.mxu1 %vm120_vm1, %v97_v19 }
  0x9e   :  { %v100_v20 = vpop.f32.mrf.mxu0 }
  0x9f   :  { %700 = vmatmul.msk.f32.gmra.mxu1 %vm120_vm1, %v100_v20 }
  0xa6   :  { %v103_v21 = vpop.f32.mrf.mxu0 }
  0xa7   :  { %701 = vmatmul.msk.f32.gmra.mxu1 %vm120_vm1, %v103_v21 }
  0xae   :  { %v106_v22 = vpop.f32.mrf.mxu0 }
  0xaf   :  { %702 = vmatmul.msk.f32.gmra.mxu1 %vm120_vm1, %v106_v22 }
  0xb6   :  { %v109_v23 = vpop.f32.mrf.mxu0 }
  0xb7   :  { %703 = vmatmul.msk.f32.gmra.mxu1 %vm120_vm1, %v109_v23 }
  0xbe   :  { %v112_v24 = vpop.f32.mrf.mxu0 }
  0xbf   :  { %704 = vmatmul.msk.f32.gmra.mxu1 %vm120_vm1, %v112_v24 }
  0xc6   :  { %v115_v25 = vpop.f32.mrf.mxu0 }
  0xc7   :  { %705 = vmatmul.msk.f32.gmra.mxu1 %vm120_vm1, %v115_v25 }
  0xcf   :  { %722 = vmatmul.msk.f32.vlgmr.msrb.gmra.mxu1 %vm52_vm0, %v350_v46  ;;  %v498_v46 = vld [vmem:[%s1109_s4] sm:$0xff] }
  0xd7   :  { %723 = vmatmul.msk.f32.gmra.mxu1 %vm52_vm0, %v351_v48  ;;  %v500_v48 = vld [vmem:[%s1109_s4 + $0x10] sm:$0xff] }
  0xdf   :  { %724 = vmatmul.msk.f32.gmra.mxu1 %vm52_vm0, %v352_v50  ;;  %v572_v50 = vld [vmem:[%s1113_s8 + $0x8] sm:$0xff] }
  0xe7   :  { %725 = vmatmul.msk.f32.gmra.mxu1 %vm52_vm0, %v353_v52  ;;  %v502_v52 = vld [vmem:[%s1109_s4 + $0x20] sm:$0xff] }
  0xef   :  { %726 = vmatmul.msk.f32.gmra.mxu1 %vm52_vm0, %v354_v55  ;;  %v505_v55 = vld [vmem:[%s1109_s4 + $0x38] sm:$0xff] }
  0xf7   :  { %727 = vmatmul.msk.f32.gmra.mxu1 %vm52_vm0, %v355_v56 }
  0xff   :  { %728 = vmatmul.msk.f32.gmra.mxu1 %vm52_vm0, %v356_v57 }
 0x107   :  { %729 = vmatmul.msk.f32.gmra.mxu1 %vm52_vm0, %v357_v58 }
 0x10c   :  { %v162_v26 = vpop.f32.mrf.mxu1 }
 0x10d   :  { %v186_v41 = vmax.f32 %v162_v26, 0.0 }
 0x114   :  { %v165_v27 = vpop.f32.mrf.mxu1 }
 0x115   :  { %v187_v40 = vmax.f32 %v165_v27, 0.0 }
 0x11c   :  { %v168_v28 = vpop.f32.mrf.mxu1 }
 0x11d   :  { %v188_v39 = vmax.f32 %v168_v28, 0.0 }
 0x124   :  { %v171_v29 = vpop.f32.mrf.mxu1 }
 0x125   :  { %v189_v38 = vmax.f32 %v171_v29, 0.0 }
 0x12c   :  { %v174_v30 = vpop.f32.mrf.mxu1 }
 0x12d   :  { %v190_v37 = vmax.f32 %v174_v30, 0.0 }
 0x134   :  { %v177_v31 = vpop.f32.mrf.mxu1 }
 0x135   :  { %v191_v36 = vmax.f32 %v177_v31, 0.0 }
 0x13c   :  { %v180_v32 = vpop.f32.mrf.mxu1 }
 0x13d   :  { %v192_v35 = vmax.f32 %v180_v32, 0.0 }
 0x144   :  { %v183_v33 = vpop.f32.mrf.mxu1 }
 0x145   :  { %v193_v34 = vmax.f32 %v183_v33, 0.0 }
 0x147   :  { %234 = vmatpush.msra.mxu2 %v193_v34 }
 0x149   :  { %235 = vmatpush.msra.mxu2 %v192_v35 }
 0x14b   :  { %236 = vmatpush.msra.mxu2 %v191_v36 }
 0x14c   :  { %v399_v5 = vpop.f32.mrf.mxu1 }
 0x14d   :  { %237 = vmatpush.msra.mxu2 %v190_v37 }
 0x14f   :  { %238 = vmatpush.msra.mxu2 %v189_v38 }
 0x151   :  { %239 = vmatpush.msra.mxu2 %v188_v39 }
 0x153   :  { %240 = vmatpush.msra.mxu2 %v187_v40 }
 0x154   :  { %v402_v7 = vpop.f32.mrf.mxu1 }
 0x155   :  { %241 = vmatpush.msra.mxu2 %v186_v41 }
 0x156   :  { %706 = vmatmul.msk.f32.vlgmr.msra.gmra.mxu2 %vm52_vm0, %v194_v42 }
 0x157   :  { %611 = vmatpush.msrb.mxu2 %v572_v50 }
 0x15c   :  { %v405_v8 = vpop.f32.mrf.mxu1 }
 0x15e   :  { %707 = vmatmul.msk.f32.gmra.mxu2 %vm52_vm0, %v195_v43 }
 0x164   :  { %v408_v9 = vpop.f32.mrf.mxu1 }
 0x166   :  { %708 = vmatmul.msk.f32.gmra.mxu2 %vm52_vm0, %v196_v44 }
 0x16c   :  { %v411_v10 = vpop.f32.mrf.mxu1 }
 0x16e   :  { %709 = vmatmul.msk.f32.gmra.mxu2 %vm52_vm0, %v197_v45 }
 0x174   :  { %v414_v11 = vpop.f32.mrf.mxu1 }
 0x176   :  { %710 = vmatmul.msk.f32.gmra.mxu2 %vm52_vm0, %v198_v47  ;;  %v499_v47 = vld [vmem:[%s1109_s4 + $0x8] sm:$0xff] }
 0x17c   :  { %v417_v12 = vpop.f32.mrf.mxu1 }
 0x17e   :  { %711 = vmatmul.msk.f32.gmra.mxu2 %vm52_vm0, %v199_v49  ;;  %v501_v49 = vld [vmem:[%s1109_s4 + $0x18] sm:$0xff] }
 0x184   :  { %v420_v13 = vpop.f32.mrf.mxu1 }
 0x186   :  { %712 = vmatmul.msk.f32.gmra.mxu2 %vm52_vm0, %v200_v51  ;;  %v571_v51 = vld [vmem:[%s1113_s8] sm:$0xff] }
 0x187   :  { %612 = vmatpush.msrb.mxu2 %v571_v51 }
 0x18e   :  { %713 = vmatmul.msk.f32.gmra.mxu2 %vm52_vm0, %v201_v54  ;;  %v504_v54 = vld [vmem:[%s1109_s4 + $0x30] sm:$0xff]  ;;  %s810_s4 = smov [#allocation2]  }
 0x18f   :  { %s658_s2 = sshll.u32 %s810_s4, 4  ;;  %s659_s2 = int_to_ptr.vmem [resolvable:$true] %s658_s2 }
 0x1d9   :  { %v243_v60 = vpop.f32.mrf.mxu2 }
 0x1da   :  { %714 = vmatmul.msk.f32.vlgmr.msra.gmra.mxu3 %vm120_vm1, %v243_v60 }
 0x1e1   :  { %v246_v61 = vpop.f32.mrf.mxu2 }
 0x1e2   :  { %715 = vmatmul.msk.f32.gmra.mxu3 %vm120_vm1, %v246_v61 }
 0x1e9   :  { %v249_v62 = vpop.f32.mrf.mxu2 }
 0x1ea   :  { %716 = vmatmul.msk.f32.gmra.mxu3 %vm120_vm1, %v249_v62 }
 0x1f1   :  { %v252_v0 = vpop.f32.mrf.mxu2 }
 0x1f2   :  { %717 = vmatmul.msk.f32.gmra.mxu3 %vm120_vm1, %v252_v0 }
 0x1f9   :  { %v255_v2 = vpop.f32.mrf.mxu2 }
 0x1fa   :  { %718 = vmatmul.msk.f32.gmra.mxu3 %vm120_vm1, %v255_v2 }
 0x201   :  { %v258_v3 = vpop.f32.mrf.mxu2 }
 0x202   :  { %719 = vmatmul.msk.f32.gmra.mxu3 %vm120_vm1, %v258_v3 }
 0x209   :  { %v261_v4 = vpop.f32.mrf.mxu2 }
 0x20a   :  { %720 = vmatmul.msk.f32.gmra.mxu3 %vm120_vm1, %v261_v4 }
 0x211   :  { %v264_v6 = vpop.f32.mrf.mxu2 }
 0x212   :  { %721 = vmatmul.msk.f32.gmra.mxu3 %vm120_vm1, %v264_v6 }
 0x21a   :  { %730 = vmatmul.msk.f32.vlgmr.msrb.gmra.mxu3 %vm120_vm1, %v399_v5 }
 0x222   :  { %731 = vmatmul.msk.f32.gmra.mxu3 %vm120_vm1, %v402_v7 }
 0x22a   :  { %732 = vmatmul.msk.f32.gmra.mxu3 %vm120_vm1, %v405_v8 }
 0x232   :  { %733 = vmatmul.msk.f32.gmra.mxu3 %vm120_vm1, %v408_v9 }
 0x23a   :  { %734 = vmatmul.msk.f32.gmra.mxu3 %vm120_vm1, %v411_v10 }
 0x242   :  { %735 = vmatmul.msk.f32.gmra.mxu3 %vm120_vm1, %v414_v11 }
 0x24a   :  { %736 = vmatmul.msk.f32.gmra.mxu3 %vm120_vm1, %v417_v12 }
 0x252   :  { %737 = vmatmul.msk.f32.gmra.mxu3 %vm120_vm1, %v420_v13 }
 0x25d   :  { %v310_v14 = vpop.f32.mrf.mxu3 }
 0x25e   :  { %v334_v15 = vmax.f32 %v310_v14, 0.0 }
 0x260   :  { %342 = vst.msk [vmem:[#allocation2] sm:$0xff] %vm120_vm1, %v334_v15 }
 0x265   :  { %v313_v16 = vpop.f32.mrf.mxu3 }
 0x266   :  { %v335_v17 = vmax.f32 %v313_v16, 0.0 }
 0x268   :  { %343 = vst.msk [vmem:[#allocation2 + $0x8] sm:$0xff] %vm120_vm1, %v335_v17 }
 0x26d   :  { %v316_v18 = vpop.f32.mrf.mxu3 }
 0x26e   :  { %v336_v19 = vmax.f32 %v316_v18, 0.0 }
 0x270   :  { %344 = vst.msk [vmem:[#allocation2 + $0x10] sm:$0xff] %vm120_vm1, %v336_v19 }
 0x275   :  { %v319_v20 = vpop.f32.mrf.mxu3 }
 0x276   :  { %v337_v21 = vmax.f32 %v319_v20, 0.0 }
 0x278   :  { %345 = vst.msk [vmem:[#allocation2 + $0x18] sm:$0xff] %vm120_vm1, %v337_v21 }
 0x27d   :  { %v322_v22 = vpop.f32.mrf.mxu3 }
 0x27e   :  { %v338_v23 = vmax.f32 %v322_v22, 0.0 }
 0x280   :  { %346 = vst.msk [vmem:[#allocation2 + $0x20] sm:$0xff] %vm120_vm1, %v338_v23 }
 0x285   :  { %v325_v24 = vpop.f32.mrf.mxu3 }
 0x286   :  { %v339_v25 = vmax.f32 %v325_v24, 0.0 }
 0x288   :  { %347 = vst.msk [vmem:[#allocation2 + $0x28] sm:$0xff] %vm120_vm1, %v339_v25 }
 0x28d   :  { %v328_v26 = vpop.f32.mrf.mxu3 }
 0x28e   :  { %v340_v27 = vmax.f32 %v328_v26, 0.0 }
 0x290   :  { %348 = vst.msk [vmem:[#allocation2 + $0x30] sm:$0xff] %vm120_vm1, %v340_v27 }
 0x295   :  { %v331_v28 = vpop.f32.mrf.mxu3 }
 0x296   :  { %v341_v29 = vmax.f32 %v331_v28, 0.0 }
 0x298   :  { %349 = vst.msk [vmem:[#allocation2 + $0x38] sm:$0xff] %vm120_vm1, %v341_v29 }
 0x299   :  { %666 = dma.vmem_to_hbm [thread:$0]  %s659_s2, 1024, %s661_s16, [#allocation3], %s811_s17, %s811_s17, %s812_s18  }
 0x29d   :  { %v466_v30 = vpop.f32.mrf.mxu3 }
 0x29e   :  { %v490_v45 = vmax.f32 %v466_v30, 0.0 }
 0x2a5   :  { %v469_v31 = vpop.f32.mrf.mxu3 }
 0x2a6   :  { %v491_v44 = vmax.f32 %v469_v31, 0.0 }
 0x2ad   :  { %v472_v32 = vpop.f32.mrf.mxu3 }
 0x2ae   :  { %v492_v43 = vmax.f32 %v472_v32, 0.0 }
 0x2b5   :  { %v475_v33 = vpop.f32.mrf.mxu3 }
 0x2b6   :  { %v493_v42 = vmax.f32 %v475_v33, 0.0 }
 0x2bd   :  { %v478_v34 = vpop.f32.mrf.mxu3 }
 0x2be   :  { %v494_v41 = vmax.f32 %v478_v34, 0.0 }
 0x2c5   :  { %v481_v35 = vpop.f32.mrf.mxu3 }
 0x2c6   :  { %v495_v40 = vmax.f32 %v481_v35, 0.0 }
 0x2cd   :  { %v484_v36 = vpop.f32.mrf.mxu3 }
 0x2ce   :  { %v496_v39 = vmax.f32 %v484_v36, 0.0 }
 0x2d5   :  { %v487_v37 = vpop.f32.mrf.mxu3 }
 0x2d6   :  { %v497_v38 = vmax.f32 %v487_v37, 0.0 }
 0x2d8   :  { %538 = vmatpush.msrb.mxu0 %v497_v38 }
 0x2da   :  { %539 = vmatpush.msrb.mxu0 %v496_v39 }
 0x2dc   :  { %540 = vmatpush.msrb.mxu0 %v495_v40 }
 0x2de   :  { %541 = vmatpush.msrb.mxu0 %v494_v41 }
 0x2e0   :  { %542 = vmatpush.msrb.mxu0 %v493_v42 }
 0x2e2   :  { %543 = vmatpush.msrb.mxu0 %v492_v43 }
 0x2e4   :  { %544 = vmatpush.msrb.mxu0 %v491_v44 }
 0x2e6   :  { %545 = vmatpush.msrb.mxu0 %v490_v45 }
 0x2e7   :  { %738 = vmatmul.msk.f32.vlgmr.msrb.gmra.mxu0 %vm52_vm0, %v498_v46 }
 0x2ef   :  { %739 = vmatmul.msk.f32.gmra.mxu0 %vm52_vm0, %v499_v47 }
 0x2f7   :  { %740 = vmatmul.msk.f32.gmra.mxu0 %vm52_vm0, %v500_v48 }
 0x2ff   :  { %741 = vmatmul.msk.f32.gmra.mxu0 %vm52_vm0, %v501_v49 }
 0x307   :  { %742 = vmatmul.msk.f32.gmra.mxu0 %vm52_vm0, %v502_v52 }
 0x30f   :  { %743 = vmatmul.msk.f32.gmra.mxu0 %vm52_vm0, %v503_v53 }
 0x317   :  { %744 = vmatmul.msk.f32.gmra.mxu0 %vm52_vm0, %v504_v54 }
 0x31f   :  { %745 = vmatmul.msk.f32.gmra.mxu0 %vm52_vm0, %v505_v55 }
 0x364   :  { %v547_v56 = vpop.f32.mrf.mxu0 }
 0x365   :  { %746 = vmatmul.msk.f32.vlgmr.msrb.gmra.mxu2 %vm120_vm1, %v547_v56 }
 0x36c   :  { %v550_v57 = vpop.f32.mrf.mxu0 }
 0x36d   :  { %747 = vmatmul.msk.f32.gmra.mxu2 %vm120_vm1, %v550_v57 }
 0x374   :  { %v553_v58 = vpop.f32.mrf.mxu0 }
 0x375   :  { %748 = vmatmul.msk.f32.gmra.mxu2 %vm120_vm1, %v553_v58 }
 0x37c   :  { %v556_v59 = vpop.f32.mrf.mxu0 }
 0x37d   :  { %749 = vmatmul.msk.f32.gmra.mxu2 %vm120_vm1, %v556_v59 }
 0x384   :  { %v559_v60 = vpop.f32.mrf.mxu0 }
 0x385   :  { %750 = vmatmul.msk.f32.gmra.mxu2 %vm120_vm1, %v559_v60 }
 0x38c   :  { %v562_v61 = vpop.f32.mrf.mxu0 }
 0x38d   :  { %751 = vmatmul.msk.f32.gmra.mxu2 %vm120_vm1, %v562_v61 }
 0x394   :  { %v565_v62 = vpop.f32.mrf.mxu0 }
 0x395   :  { %752 = vmatmul.msk.f32.gmra.mxu2 %vm120_vm1, %v565_v62 }
 0x39c   :  { %v568_v63 = vpop.f32.mrf.mxu0 }
 0x39d   :  { %753 = vmatmul.msk.f32.gmra.mxu2 %vm120_vm1, %v568_v63 }
 0x3e8   :  { %v614_v0 = vpop.f32.mrf.mxu2 }
 0x3e9   :  { %v638_v1 = vmax.f32 %v614_v0, 0.0 }
 0x3eb   :  { %646 = vst.msk [vmem:[#allocation4] sm:$0xff] %vm120_vm1, %v638_v1 }
 0x3f0   :  { %v617_v2 = vpop.f32.mrf.mxu2 }
 0x3f1   :  { %v639_v3 = vmax.f32 %v617_v2, 0.0 }
 0x3f3   :  { %647 = vst.msk [vmem:[#allocation4 + $0x8] sm:$0xff] %vm120_vm1, %v639_v3 }
 0x3f8   :  { %v620_v4 = vpop.f32.mrf.mxu2 }
 0x3f9   :  { %v640_v5 = vmax.f32 %v620_v4, 0.0 }
 0x3fb   :  { %648 = vst.msk [vmem:[#allocation4 + $0x10] sm:$0xff] %vm120_vm1, %v640_v5 }
 0x400   :  { %v623_v6 = vpop.f32.mrf.mxu2 }
 0x401   :  { %v641_v7 = vmax.f32 %v623_v6, 0.0 }
 0x403   :  { %649 = vst.msk [vmem:[#allocation4 + $0x18] sm:$0xff] %vm120_vm1, %v641_v7 }
 0x408   :  { %v626_v8 = vpop.f32.mrf.mxu2 }
 0x409   :  { %v642_v9 = vmax.f32 %v626_v8, 0.0 }
 0x40b   :  { %650 = vst.msk [vmem:[#allocation4 + $0x20] sm:$0xff] %vm120_vm1, %v642_v9 }
 0x410   :  { %v629_v10 = vpop.f32.mrf.mxu2 }
 0x411   :  { %v643_v11 = vmax.f32 %v629_v10, 0.0 }
 0x413   :  { %651 = vst.msk [vmem:[#allocation4 + $0x28] sm:$0xff] %vm120_vm1, %v643_v11 }
 0x418   :  { %v632_v12 = vpop.f32.mrf.mxu2 }
 0x419   :  { %v644_v13 = vmax.f32 %v632_v12, 0.0 }
 0x41b   :  { %652 = vst.msk [vmem:[#allocation4 + $0x30] sm:$0xff] %vm120_vm1, %v644_v13 }
 0x420   :  { %v635_v14 = vpop.f32.mrf.mxu2 }
 0x421   :  { %v645_v15 = vmax.f32 %v635_v14, 0.0 }
 0x423   :  { %653 = vst.msk [vmem:[#allocation4 + $0x38] sm:$0xff] %vm120_vm1, %v645_v15 }
 0x424   :  { %679 = dma.vmem_to_hbm [thread:$0]  %s672_s3, 1024, %s674_s19, [#allocation5], %s811_s17, %s811_s17, %s812_s18  }
 0x425   :  { %806 = dma.done.wait [#allocation3], 1024  }
 0x426   :  { %807 = vsyncadd [#allocation3], 4294966272 }
 0x427   :  { %808 = dma.done.wait [#allocation5], 1024  }
 0x428   :  { %809 = vsyncadd [#allocation5], 4294966272 }
 0x429   :  { %688 = vsyncpa [#allocation3], 1 }
 0x42a   :  { %689 = vsyncpa [#allocation5], 1 }

</bundles_post_ra>
